<compile_context>
chip_gen: v7x
topology: tpu7x:2x2x1
jax: 0.10.0
libtpu: 0.0.40
codegen_flags: <defaults>
</compile_context>

<pallas_src>
import functools

import jax
import jax.numpy as jnp
from jax.experimental import pallas as pl
from jax.experimental.pallas import tpu as pltpu

LANE = 128          # TPU lane width; all feature dims are zero-padded to this.
_BN_EPS = 1e-5


# ----------------------------- Pallas kernel --------------------------------

def _bn_relu(y, gamma, beta, inv_n):
    """Training-mode BatchNorm1d (batch stats, biased variance) + ReLU.

    Single-pass statistics so the two cross-sublane reductions issue
    back-to-back.  Zero-padded lanes (gamma = beta = 0) stay exactly zero.
    """
    s = jnp.sum(y, axis=0, keepdims=True)
    ss = jnp.sum(y * y, axis=0, keepdims=True)
    mean = s * inv_n
    var = jnp.maximum(ss * inv_n - mean * mean, 0.0)
    y_hat = (y - mean) * jax.lax.rsqrt(var + _BN_EPS)
    return jnp.maximum(gamma * y_hat + beta, 0.0)


def _tfc_branch_kernel(x_ref, w_ref, v_ref, o_ref, *, batch):
    """One encoder+projector branch, fully fused, all operands lane-padded.

    grid=(2,) iterates (v7x: parallelizes across TensorCores) over branches.
      x_ref : (B, 128)       flattened input, zero-padded past d_in
      w_ref : (5, 128, 128)  zero-padded weights  [w1, w2, w3, pw1, pw2]
      v_ref : (8, 128)       zero-padded vectors  [g1, be1, g2, be2, b3, pg, pbe, pb2]
      o_ref : (2, B, 128)    o[0] = h (padded), o[1] = z (padded)

    Biases that feed straight into training-mode BatchNorm (b1, b2, pb1) are
    omitted: they are cancelled exactly by the BN mean subtraction.
    """
    inv_n = jnp.float32(1.0 / batch)
    x = x_ref[...]

    # EnconderMLP: Linear -> BN -> ReLU -> Linear -> BN -> ReLU -> Linear
    y1 = jnp.dot(x, w_ref[0], preferred_element_type=jnp.float32)
    a1 = _bn_relu(y1, v_ref[0:1, :], v_ref[1:2, :], inv_n)
    y2 = jnp.dot(a1, w_ref[1], preferred_element_type=jnp.float32)
    a2 = _bn_relu(y2, v_ref[2:3, :], v_ref[3:4, :], inv_n)
    h = jnp.dot(a2, w_ref[2], preferred_element_type=jnp.float32) + v_ref[4:5, :]

    # projector: Linear -> BN -> ReLU -> Linear
    p1 = jnp.dot(h, w_ref[3], preferred_element_type=jnp.float32)
    a3 = _bn_relu(p1, v_ref[5:6, :], v_ref[6:7, :], inv_n)
    z = jnp.dot(a3, w_ref[4], preferred_element_type=jnp.float32) + v_ref[7:8, :]

    # Lane-dense, unmasked full-tile stores.
    o_ref[0] = h
    o_ref[1] = z


def tfc_backbone_pallas(x_flat2, w_all, v_all):
    """x_flat2: (2, B, 128); w_all: (2, 5, 128, 128); v_all: (2, 8, 128).
    Returns (2, 2, B, 128): per branch, [h_padded, z_padded]."""
    B = x_flat2.shape[1]
    kernel = functools.partial(_tfc_branch_kernel, batch=B)
    return pl.pallas_call(
        kernel,
        out_shape=jax.ShapeDtypeStruct((2, 2, B, LANE), jnp.float32),
        grid_spec=pltpu.PrefetchScalarGridSpec(
            num_scalar_prefetch=0,
            grid=(2,),  # time branch / frequency branch
            in_specs=[
                pl.BlockSpec((None, B, LANE), lambda i: (i, 0, 0)),
                pl.BlockSpec((None, 5, LANE, LANE), lambda i: (i, 0, 0, 0)),
                pl.BlockSpec((None, 8, LANE), lambda i: (i, 0, 0)),
            ],
            out_specs=pl.BlockSpec((None, 2, B, LANE), lambda i: (i, 0, 0, 0)),
        ),
        compiler_params=pltpu.CompilerParams(
            dimension_semantics=("parallel",)),  # one branch per TC on v7x
    )(x_flat2, w_all, v_all)


# ------------------------------- wrappers ------------------------------------

def tfc_backbone_forward(x_in_t, x_in_f, packed_params, encoding_dim):
    """Mirrors TFCBackbone.forward -> (h_time, z_time, h_freq, z_freq)."""
    w_all, v_all = packed_params
    B = x_in_t.shape[0]
    xt = x_in_t.reshape(B, -1).astype(jnp.float32)   # MLP encoder flattens (B, C, L)
    xf = x_in_f.reshape(B, -1).astype(jnp.float32)
    d_in = xt.shape[1]
    x2 = jnp.zeros((2, B, LANE), jnp.float32)
    x2 = x2.at[0, :, :d_in].set(xt)
    x2 = x2.at[1, :, :d_in].set(xf)

    out = tfc_backbone_pallas(x2, w_all, v_all)

    E = encoding_dim
    h_time = out[0, 0, :, :E]
    z_time = out[0, 1, :, :E // 2]
    h_freq = out[1, 0, :, :E]
    z_freq = out[1, 1, :, :E // 2]
    return h_time, z_time, h_freq, z_freq


# --------------------------- init & param packing -----------------------------

def _init_linear(key, d_in, d_out):
    """PyTorch-style uniform init; weight stored already transposed to (in, out)."""
    kw, kb = jax.random.split(key)
    bound = 1.0 / (d_in ** 0.5)
    w = jax.random.uniform(kw, (d_in, d_out), jnp.float32, -bound, bound)
    b = jax.random.uniform(kb, (d_out,), jnp.float32, -bound, bound)
    return w, b


def init_branch_params(key, d_in_flat, h_dims, encoding_dim):
    keys = jax.random.split(key, 5)
    w1, b1 = _init_linear(keys[0], d_in_flat, h_dims[0])
    g1, be1 = jnp.ones((h_dims[0],), jnp.float32), jnp.zeros((h_dims[0],), jnp.float32)
    w2, b2 = _init_linear(keys[1], h_dims[0], h_dims[1])
    g2, be2 = jnp.ones((h_dims[1],), jnp.float32), jnp.zeros((h_dims[1],), jnp.float32)
    w3, b3 = _init_linear(keys[2], h_dims[1], h_dims[2])
    # projector: Linear(E, E) -> BN(E) -> ReLU -> Linear(E, E//2)
    pw1, pb1 = _init_linear(keys[3], h_dims[2], encoding_dim)
    pg, pbe = jnp.ones((encoding_dim,), jnp.float32), jnp.zeros((encoding_dim,), jnp.float32)
    pw2, pb2 = _init_linear(keys[4], encoding_dim, encoding_dim // 2)
    return dict(w1=w1, b1=b1, g1=g1, be1=be1, w2=w2, b2=b2, g2=g2, be2=be2,
                w3=w3, b3=b3, pw1=pw1, pb1=pb1, pg=pg, pbe=pbe, pw2=pw2, pb2=pb2)


def pack_branch(p, d_in, h_dims, E):
    """Pack one branch into a (5,128,128) weight slab and an (8,128) vector slab.
    b1/b2/pb1 are intentionally omitted: they precede training-mode BN and cancel."""
    W = jnp.zeros((5, LANE, LANE), jnp.float32)
    W = W.at[0, :d_in, :h_dims[0]].set(p['w1'])
    W = W.at[1, :h_dims[0], :h_dims[1]].set(p['w2'])
    W = W.at[2, :h_dims[1], :h_dims[2]].set(p['w3'])
    W = W.at[3, :h_dims[2], :E].set(p['pw1'])
    W = W.at[4, :E, :E // 2].set(p['pw2'])
    V = jnp.zeros((8, LANE), jnp.float32)
    V = V.at[0, :h_dims[0]].set(p['g1'])
    V = V.at[1, :h_dims[0]].set(p['be1'])
    V = V.at[2, :h_dims[1]].set(p['g2'])
    V = V.at[3, :h_dims[1]].set(p['be2'])
    V = V.at[4, :h_dims[2]].set(p['b3'])
    V = V.at[5, :E].set(p['pg'])
    V = V.at[6, :E].set(p['pbe'])
    V = V.at[7, :E // 2].set(p['pb2'])
    return W, V


def pack_params(params_t, params_f, d_in, h_dims, E):
    Wt, Vt = pack_branch(params_t, d_in, h_dims, E)
    Wf, Vf = pack_branch(params_f, d_in, h_dims, E)
    return jnp.stack([Wt, Wf]), jnp.stack([Vt, Vf])


# ------------------------------ pure-JAX reference ----------------------------

def _ref_branch(x_flat, p):
    """Bias-included, two-pass-BN reference (PyTorch-equivalent math)."""
    def bn_relu(y, g, b):
        mean = jnp.mean(y, axis=0, keepdims=True)
        var = jnp.mean((y - mean) ** 2, axis=0, keepdims=True)
        return jnp.maximum(g * (y - mean) * jax.lax.rsqrt(var + _BN_EPS) + b, 0.0)
    a1 = bn_relu(x_flat @ p['w1'] + p['b1'], p['g1'], p['be1'])
    a2 = bn_relu(a1 @ p['w2'] + p['b2'], p['g2'], p['be2'])
    h = a2 @ p['w3'] + p['b3']
    a3 = bn_relu(h @ p['pw1'] + p['pb1'], p['pg'], p['pbe'])
    z = a3 @ p['pw2'] + p['pb2']
    return h, z


# ---------------------------------- main --------------------------------------

if __name__ == "__main__":
    # Small shapes consistent with the module (layer_type='mlp')
    B, input_dim, seq_len, encoding_dim = 8, 4, 8, 32
    h_dims = [encoding_dim // 4, encoding_dim // 2, encoding_dim]   # [8, 16, 32]
    d_in_flat = input_dim * seq_len
    assert B % 8 == 0
    assert max(h_dims + [d_in_flat, encoding_dim]) <= LANE

    key = jax.random.PRNGKey(0)
    k_x, k_t, k_f = jax.random.split(key, 3)

    # Time-domain input (B, C, L); frequency input is |FFT| of it (TF-C convention).
    x_in_t = jax.random.normal(k_x, (B, input_dim, seq_len), jnp.float32)
    x_in_f = jnp.abs(jnp.fft.fft(x_in_t, axis=-1)).astype(jnp.float32)

    params_t = init_branch_params(k_t, d_in_flat, h_dims, encoding_dim)
    params_f = init_branch_params(k_f, d_in_flat, h_dims, encoding_dim)
    packed = pack_params(params_t, params_f, d_in_flat, h_dims, encoding_dim)

    h_time, z_time, h_freq, z_freq = tfc_backbone_forward(
        x_in_t, x_in_f, packed, encoding_dim)
    jax.block_until_ready((h_time, z_time, h_freq, z_freq))

    assert h_time.shape == (B, encoding_dim)
    assert z_time.shape == (B, encoding_dim // 2)
    assert h_freq.shape == (B, encoding_dim)
    assert z_freq.shape == (B, encoding_dim // 2)

    # Numerical parity with the PyTorch-equivalent reference.
    ht_ref, zt_ref = _ref_branch(x_in_t.reshape(B, -1), params_t)
    hf_ref, zf_ref = _ref_branch(x_in_f.reshape(B, -1), params_f)
    for got, ref in ((h_time, ht_ref), (z_time, zt_ref),
                     (h_freq, hf_ref), (z_freq, zf_ref)):
        err = float(jnp.max(jnp.abs(got - ref)))
        assert err < 1e-2, f"mismatch vs reference: {err}"

    print("KERNEL_OK")
</pallas_src>

<mosaic_0001>
module attributes {stable_mosaic.version = 11 : i64} {
  func.func @_tfc_branch_kernel(%arg0: i32, %arg1: memref<1x8x128xf32, #tpu.memory_space<vmem>>, %arg2: memref<1x5x128x128xf32, #tpu.memory_space<vmem>>, %arg3: memref<1x8x128xf32, #tpu.memory_space<vmem>>, %arg4: memref<1x2x8x128xf32, #tpu.memory_space<vmem>>) attributes {dimension_semantics = [#tpu.dimension_semantics<parallel>], iteration_bounds = array<i64: 2>, scalar_prefetch = 0 : i64, scratch_operands = 0 : i64, tpu.core_type = #tpu.core_type<tc>, window_params = [{transform_indices = @transform_0, window_bounds = array<i64: 1, 8, 128>}, {transform_indices = @transform_1, window_bounds = array<i64: 1, 5, 128, 128>}, {transform_indices = @transform_2, window_bounds = array<i64: 1, 8, 128>}, {transform_indices = @transform_3, window_bounds = array<i64: 1, 2, 8, 128>}]} {
    %c0 = arith.constant 0 : index
    %c0_0 = arith.constant 0 : index
    %c0_1 = arith.constant 0 : index
    %0 = vector.load %arg1[%c0, %c0_0, %c0_1] : memref<1x8x128xf32, #tpu.memory_space<vmem>>, vector<1x8x128xf32>
    %1 = vector.shape_cast %0 : vector<1x8x128xf32> to vector<8x128xf32>
    %c0_2 = arith.constant 0 : index
    %c0_3 = arith.constant 0 : index
    %c0_4 = arith.constant 0 : index
    %c0_5 = arith.constant 0 : index
    %2 = vector.load %arg2[%c0_2, %c0_3, %c0_4, %c0_5] : memref<1x5x128x128xf32, #tpu.memory_space<vmem>>, vector<1x1x128x128xf32>
    %3 = vector.shape_cast %2 : vector<1x1x128x128xf32> to vector<128x128xf32>
    %cst = arith.constant dense<0.000000e+00> : vector<8x128xf32>
    %4 = tpu.matmul %1, %3, %cst {dimension_numbers = #tpu.dot_dimension_numbers<[1], [0], [0], [1], [0, 0, 1, 1], [], []>} : vector<8x128xf32>, vector<128x128xf32>, vector<8x128xf32> -> vector<8x128xf32>
    %c0_6 = arith.constant 0 : index
    %c0_7 = arith.constant 0 : index
    %c0_8 = arith.constant 0 : index
    %5 = vector.load %arg3[%c0_6, %c0_7, %c0_8] : memref<1x8x128xf32, #tpu.memory_space<vmem>>, vector<1x1x128xf32>
    %6 = vector.shape_cast %5 : vector<1x1x128xf32> to vector<1x128xf32>
    %c0_9 = arith.constant 0 : index
    %c1 = arith.constant 1 : index
    %c0_10 = arith.constant 0 : index
    %7 = vector.load %arg3[%c0_9, %c1, %c0_10] : memref<1x8x128xf32, #tpu.memory_space<vmem>>, vector<1x1x128xf32>
    %8 = vector.shape_cast %7 : vector<1x1x128xf32> to vector<1x128xf32>
    %cst_11 = arith.constant dense<0.000000e+00> : vector<128xf32>
    %9 = vector.multi_reduction <add>, %4, %cst_11 [0] : vector<8x128xf32> to vector<128xf32>
    %10 = vector.shape_cast %9 : vector<128xf32> to vector<1x128xf32>
    %11 = arith.mulf %4, %4 : vector<8x128xf32>
    %cst_12 = arith.constant dense<0.000000e+00> : vector<128xf32>
    %12 = vector.multi_reduction <add>, %11, %cst_12 [0] : vector<8x128xf32> to vector<128xf32>
    %13 = vector.shape_cast %12 : vector<128xf32> to vector<1x128xf32>
    %cst_13 = arith.constant 1.250000e-01 : f32
    %14 = vector.broadcast %cst_13 : f32 to vector<1x128xf32>
    %15 = arith.mulf %10, %14 : vector<1x128xf32>
    %cst_14 = arith.constant 1.250000e-01 : f32
    %16 = vector.broadcast %cst_14 : f32 to vector<1x128xf32>
    %17 = arith.mulf %13, %16 : vector<1x128xf32>
    %18 = arith.mulf %15, %15 : vector<1x128xf32>
    %19 = arith.subf %17, %18 : vector<1x128xf32>
    %cst_15 = arith.constant 0.000000e+00 : f32
    %20 = vector.broadcast %cst_15 : f32 to vector<1x128xf32>
    %21 = arith.maximumf %19, %20 : vector<1x128xf32>
    %22 = vector.broadcast %15 : vector<1x128xf32> to vector<8x128xf32>
    %23 = arith.subf %4, %22 : vector<8x128xf32>
    %cst_16 = arith.constant 9.99999974E-6 : f32
    %24 = vector.broadcast %cst_16 : f32 to vector<1x128xf32>
    %25 = arith.addf %21, %24 : vector<1x128xf32>
    %26 = math.rsqrt %25 : vector<1x128xf32>
    %27 = vector.broadcast %26 : vector<1x128xf32> to vector<8x128xf32>
    %28 = arith.mulf %23, %27 : vector<8x128xf32>
    %29 = vector.broadcast %6 : vector<1x128xf32> to vector<8x128xf32>
    %30 = arith.mulf %29, %28 : vector<8x128xf32>
    %31 = vector.broadcast %8 : vector<1x128xf32> to vector<8x128xf32>
    %32 = arith.addf %30, %31 : vector<8x128xf32>
    %cst_17 = arith.constant 0.000000e+00 : f32
    %33 = vector.broadcast %cst_17 : f32 to vector<8x128xf32>
    %34 = arith.maximumf %32, %33 : vector<8x128xf32>
    %c0_18 = arith.constant 0 : index
    %c1_19 = arith.constant 1 : index
    %c0_20 = arith.constant 0 : index
    %c0_21 = arith.constant 0 : index
    %35 = vector.load %arg2[%c0_18, %c1_19, %c0_20, %c0_21] : memref<1x5x128x128xf32, #tpu.memory_space<vmem>>, vector<1x1x128x128xf32>
    %36 = vector.shape_cast %35 : vector<1x1x128x128xf32> to vector<128x128xf32>
    %cst_22 = arith.constant dense<0.000000e+00> : vector<8x128xf32>
    %37 = tpu.matmul %34, %36, %cst_22 {dimension_numbers = #tpu.dot_dimension_numbers<[1], [0], [0], [1], [0, 0, 1, 1], [], []>} : vector<8x128xf32>, vector<128x128xf32>, vector<8x128xf32> -> vector<8x128xf32>
    %c0_23 = arith.constant 0 : index
    %c2 = arith.constant 2 : index
    %c0_24 = arith.constant 0 : index
    %38 = vector.load %arg3[%c0_23, %c2, %c0_24] : memref<1x8x128xf32, #tpu.memory_space<vmem>>, vector<1x1x128xf32>
    %39 = vector.shape_cast %38 : vector<1x1x128xf32> to vector<1x128xf32>
    %c0_25 = arith.constant 0 : index
    %c3 = arith.constant 3 : index
    %c0_26 = arith.constant 0 : index
    %40 = vector.load %arg3[%c0_25, %c3, %c0_26] : memref<1x8x128xf32, #tpu.memory_space<vmem>>, vector<1x1x128xf32>
    %41 = vector.shape_cast %40 : vector<1x1x128xf32> to vector<1x128xf32>
    %cst_27 = arith.constant dense<0.000000e+00> : vector<128xf32>
    %42 = vector.multi_reduction <add>, %37, %cst_27 [0] : vector<8x128xf32> to vector<128xf32>
    %43 = vector.shape_cast %42 : vector<128xf32> to vector<1x128xf32>
    %44 = arith.mulf %37, %37 : vector<8x128xf32>
    %cst_28 = arith.constant dense<0.000000e+00> : vector<128xf32>
    %45 = vector.multi_reduction <add>, %44, %cst_28 [0] : vector<8x128xf32> to vector<128xf32>
    %46 = vector.shape_cast %45 : vector<128xf32> to vector<1x128xf32>
    %cst_29 = arith.constant 1.250000e-01 : f32
    %47 = vector.broadcast %cst_29 : f32 to vector<1x128xf32>
    %48 = arith.mulf %43, %47 : vector<1x128xf32>
    %cst_30 = arith.constant 1.250000e-01 : f32
    %49 = vector.broadcast %cst_30 : f32 to vector<1x128xf32>
    %50 = arith.mulf %46, %49 : vector<1x128xf32>
    %51 = arith.mulf %48, %48 : vector<1x128xf32>
    %52 = arith.subf %50, %51 : vector<1x128xf32>
    %cst_31 = arith.constant 0.000000e+00 : f32
    %53 = vector.broadcast %cst_31 : f32 to vector<1x128xf32>
    %54 = arith.maximumf %52, %53 : vector<1x128xf32>
    %55 = vector.broadcast %48 : vector<1x128xf32> to vector<8x128xf32>
    %56 = arith.subf %37, %55 : vector<8x128xf32>
    %cst_32 = arith.constant 9.99999974E-6 : f32
    %57 = vector.broadcast %cst_32 : f32 to vector<1x128xf32>
    %58 = arith.addf %54, %57 : vector<1x128xf32>
    %59 = math.rsqrt %58 : vector<1x128xf32>
    %60 = vector.broadcast %59 : vector<1x128xf32> to vector<8x128xf32>
    %61 = arith.mulf %56, %60 : vector<8x128xf32>
    %62 = vector.broadcast %39 : vector<1x128xf32> to vector<8x128xf32>
    %63 = arith.mulf %62, %61 : vector<8x128xf32>
    %64 = vector.broadcast %41 : vector<1x128xf32> to vector<8x128xf32>
    %65 = arith.addf %63, %64 : vector<8x128xf32>
    %cst_33 = arith.constant 0.000000e+00 : f32
    %66 = vector.broadcast %cst_33 : f32 to vector<8x128xf32>
    %67 = arith.maximumf %65, %66 : vector<8x128xf32>
    %c0_34 = arith.constant 0 : index
    %c2_35 = arith.constant 2 : index
    %c0_36 = arith.constant 0 : index
    %c0_37 = arith.constant 0 : index
    %68 = vector.load %arg2[%c0_34, %c2_35, %c0_36, %c0_37] : memref<1x5x128x128xf32, #tpu.memory_space<vmem>>, vector<1x1x128x128xf32>
    %69 = vector.shape_cast %68 : vector<1x1x128x128xf32> to vector<128x128xf32>
    %cst_38 = arith.constant dense<0.000000e+00> : vector<8x128xf32>
    %70 = tpu.matmul %67, %69, %cst_38 {dimension_numbers = #tpu.dot_dimension_numbers<[1], [0], [0], [1], [0, 0, 1, 1], [], []>} : vector<8x128xf32>, vector<128x128xf32>, vector<8x128xf32> -> vector<8x128xf32>
    %c0_39 = arith.constant 0 : index
    %c4 = arith.constant 4 : index
    %c0_40 = arith.constant 0 : index
    %71 = vector.load %arg3[%c0_39, %c4, %c0_40] : memref<1x8x128xf32, #tpu.memory_space<vmem>>, vector<1x1x128xf32>
    %72 = vector.shape_cast %71 : vector<1x1x128xf32> to vector<1x128xf32>
    %73 = vector.broadcast %72 : vector<1x128xf32> to vector<8x128xf32>
    %74 = arith.addf %70, %73 : vector<8x128xf32>
    %c0_41 = arith.constant 0 : index
    %c3_42 = arith.constant 3 : index
    %c0_43 = arith.constant 0 : index
    %c0_44 = arith.constant 0 : index
    %75 = vector.load %arg2[%c0_41, %c3_42, %c0_43, %c0_44] : memref<1x5x128x128xf32, #tpu.memory_space<vmem>>, vector<1x1x128x128xf32>
    %76 = vector.shape_cast %75 : vector<1x1x128x128xf32> to vector<128x128xf32>
    %cst_45 = arith.constant dense<0.000000e+00> : vector<8x128xf32>
    %77 = tpu.matmul %74, %76, %cst_45 {dimension_numbers = #tpu.dot_dimension_numbers<[1], [0], [0], [1], [0, 0, 1, 1], [], []>} : vector<8x128xf32>, vector<128x128xf32>, vector<8x128xf32> -> vector<8x128xf32>
    %c0_46 = arith.constant 0 : index
    %c5 = arith.constant 5 : index
    %c0_47 = arith.constant 0 : index
    %78 = vector.load %arg3[%c0_46, %c5, %c0_47] : memref<1x8x128xf32, #tpu.memory_space<vmem>>, vector<1x1x128xf32>
    %79 = vector.shape_cast %78 : vector<1x1x128xf32> to vector<1x128xf32>
    %c0_48 = arith.constant 0 : index
    %c6 = arith.constant 6 : index
    %c0_49 = arith.constant 0 : index
    %80 = vector.load %arg3[%c0_48, %c6, %c0_49] : memref<1x8x128xf32, #tpu.memory_space<vmem>>, vector<1x1x128xf32>
    %81 = vector.shape_cast %80 : vector<1x1x128xf32> to vector<1x128xf32>
    %cst_50 = arith.constant dense<0.000000e+00> : vector<128xf32>
    %82 = vector.multi_reduction <add>, %77, %cst_50 [0] : vector<8x128xf32> to vector<128xf32>
    %83 = vector.shape_cast %82 : vector<128xf32> to vector<1x128xf32>
    %84 = arith.mulf %77, %77 : vector<8x128xf32>
    %cst_51 = arith.constant dense<0.000000e+00> : vector<128xf32>
    %85 = vector.multi_reduction <add>, %84, %cst_51 [0] : vector<8x128xf32> to vector<128xf32>
    %86 = vector.shape_cast %85 : vector<128xf32> to vector<1x128xf32>
    %cst_52 = arith.constant 1.250000e-01 : f32
    %87 = vector.broadcast %cst_52 : f32 to vector<1x128xf32>
    %88 = arith.mulf %83, %87 : vector<1x128xf32>
    %cst_53 = arith.constant 1.250000e-01 : f32
    %89 = vector.broadcast %cst_53 : f32 to vector<1x128xf32>
    %90 = arith.mulf %86, %89 : vector<1x128xf32>
    %91 = arith.mulf %88, %88 : vector<1x128xf32>
    %92 = arith.subf %90, %91 : vector<1x128xf32>
    %cst_54 = arith.constant 0.000000e+00 : f32
    %93 = vector.broadcast %cst_54 : f32 to vector<1x128xf32>
    %94 = arith.maximumf %92, %93 : vector<1x128xf32>
    %95 = vector.broadcast %88 : vector<1x128xf32> to vector<8x128xf32>
    %96 = arith.subf %77, %95 : vector<8x128xf32>
    %cst_55 = arith.constant 9.99999974E-6 : f32
    %97 = vector.broadcast %cst_55 : f32 to vector<1x128xf32>
    %98 = arith.addf %94, %97 : vector<1x128xf32>
    %99 = math.rsqrt %98 : vector<1x128xf32>
    %100 = vector.broadcast %99 : vector<1x128xf32> to vector<8x128xf32>
    %101 = arith.mulf %96, %100 : vector<8x128xf32>
    %102 = vector.broadcast %79 : vector<1x128xf32> to vector<8x128xf32>
    %103 = arith.mulf %102, %101 : vector<8x128xf32>
    %104 = vector.broadcast %81 : vector<1x128xf32> to vector<8x128xf32>
    %105 = arith.addf %103, %104 : vector<8x128xf32>
    %cst_56 = arith.constant 0.000000e+00 : f32
    %106 = vector.broadcast %cst_56 : f32 to vector<8x128xf32>
    %107 = arith.maximumf %105, %106 : vector<8x128xf32>
    %c0_57 = arith.constant 0 : index
    %c4_58 = arith.constant 4 : index
    %c0_59 = arith.constant 0 : index
    %c0_60 = arith.constant 0 : index
    %108 = vector.load %arg2[%c0_57, %c4_58, %c0_59, %c0_60] : memref<1x5x128x128xf32, #tpu.memory_space<vmem>>, vector<1x1x128x128xf32>
    %109 = vector.shape_cast %108 : vector<1x1x128x128xf32> to vector<128x128xf32>
    %cst_61 = arith.constant dense<0.000000e+00> : vector<8x128xf32>
    %110 = tpu.matmul %107, %109, %cst_61 {dimension_numbers = #tpu.dot_dimension_numbers<[1], [0], [0], [1], [0, 0, 1, 1], [], []>} : vector<8x128xf32>, vector<128x128xf32>, vector<8x128xf32> -> vector<8x128xf32>
    %c0_62 = arith.constant 0 : index
    %c7 = arith.constant 7 : index
    %c0_63 = arith.constant 0 : index
    %111 = vector.load %arg3[%c0_62, %c7, %c0_63] : memref<1x8x128xf32, #tpu.memory_space<vmem>>, vector<1x1x128xf32>
    %112 = vector.shape_cast %111 : vector<1x1x128xf32> to vector<1x128xf32>
    %113 = vector.broadcast %112 : vector<1x128xf32> to vector<8x128xf32>
    %114 = arith.addf %110, %113 : vector<8x128xf32>
    %c0_64 = arith.constant 0 : index
    %c0_65 = arith.constant 0 : index
    %c0_66 = arith.constant 0 : index
    %c0_67 = arith.constant 0 : index
    %115 = vector.load %arg4[%c0_64, %c0_65, %c0_66, %c0_67] : memref<1x2x8x128xf32, #tpu.memory_space<vmem>>, vector<1x1x8x128xf32>
    %116 = vector.shape_cast %115 : vector<1x1x8x128xf32> to vector<8x128xf32>
    %117 = vector.shape_cast %74 : vector<8x128xf32> to vector<1x1x8x128xf32>
    tpu.vector_store %arg4[%c0_64, %c0_65, %c0_66, %c0_67], %117 {strides = array<i32>} : memref<1x2x8x128xf32, #tpu.memory_space<vmem>>, vector<1x1x8x128xf32>,
    %c0_68 = arith.constant 0 : index
    %c1_69 = arith.constant 1 : index
    %c0_70 = arith.constant 0 : index
    %c0_71 = arith.constant 0 : index
    %118 = vector.load %arg4[%c0_68, %c1_69, %c0_70, %c0_71] : memref<1x2x8x128xf32, #tpu.memory_space<vmem>>, vector<1x1x8x128xf32>
    %119 = vector.shape_cast %118 : vector<1x1x8x128xf32> to vector<8x128xf32>
    %120 = vector.shape_cast %114 : vector<8x128xf32> to vector<1x1x8x128xf32>
    tpu.vector_store %arg4[%c0_68, %c1_69, %c0_70, %c0_71], %120 {strides = array<i32>} : memref<1x2x8x128xf32, #tpu.memory_space<vmem>>, vector<1x1x8x128xf32>,
    return
  }
  func.func @transform_0(%arg0: i32) -> (i32, i32, i32) {
    %c0_i32 = arith.constant 0 : i32
    %c0_i32_0 = arith.constant 0 : i32
    %c0_i32_1 = arith.constant 0 : i32
    return %arg0, %c0_i32, %c0_i32_0 : i32, i32, i32
  }
  func.func @transform_1(%arg0: i32) -> (i32, i32, i32, i32) {
    %c0_i32 = arith.constant 0 : i32
    %c0_i32_0 = arith.constant 0 : i32
    %c0_i32_1 = arith.constant 0 : i32
    %c0_i32_2 = arith.constant 0 : i32
    return %arg0, %c0_i32, %c0_i32_0, %c0_i32_1 : i32, i32, i32, i32
  }
  func.func @transform_2(%arg0: i32) -> (i32, i32, i32) {
    %c0_i32 = arith.constant 0 : i32
    %c0_i32_0 = arith.constant 0 : i32
    %c0_i32_1 = arith.constant 0 : i32
    return %arg0, %c0_i32, %c0_i32_0 : i32, i32, i32
  }
  func.func @transform_3(%arg0: i32) -> (i32, i32, i32, i32) {
    %c0_i32 = arith.constant 0 : i32
    %c0_i32_0 = arith.constant 0 : i32
    %c0_i32_1 = arith.constant 0 : i32
    %c0_i32_2 = arith.constant 0 : i32
    return %arg0, %c0_i32, %c0_i32_0, %c0_i32_1 : i32, i32, i32, i32
  }
}

</mosaic_0001>

<bundles_post_ra>
// kernel: tpu_custom_call.1
= control target key start
LH: loop header
LB: loop body
LE: loop exit
PB: predicated region body
PF: predicated region fallthrough
CT: control target
= control target key end

     0   :  { %8 = vsyncpa [#allocation3], 0  ;;  %s2066_s0 = inlined_call_operand.hbm [shape: f32[2,8,128], index: 0, kind: input, shape index: {}]   ;;  %s2067_s1 = inlined_call_operand.hbm [shape: f32[2,5,128,128], index: 1, kind: input, shape index: {}]   ;;  %s2068_s2 = inlined_call_operand.hbm [shape: f32[2,8,128], index: 2, kind: input, shape index: {}]   ;;  %s2069_s3 = inlined_call_operand.hbm [shape: f32[2,2,8,128], index: 3, kind: output, shape index: {}]  }
   0x1   :  { %10 = vsyncpa [#allocation3 + $0x1], 0 }
   0x2   :  { %11 = vsyncpa [#allocation6], 0 }
   0x3   :  { %13 = vsyncpa [#allocation6 + $0x1], 0 }
   0x4   :  { %14 = vsyncpa [#allocation4], 0 }
   0x5   :  { %16 = vsyncpa [#allocation4 + $0x1], 0  ;;  %s1679_s12 = smov 0   ;;  %s1681_s13 = smov 0  }
   0x6   :  { %s1683_s14 = smov 0   ;;  %s1685_s15 = smov 0  }
   0x7 LB: > { %s1700_s16 = sadd.s32 4294967295, %s1646_s15   ;;  %s943_s17 = sadd.s32 4294967294, %s1646_s15   ;;  %s1646_s15 = sphi %s1685_s15, %s2095_s15   ;;  %s1642_s14 = sphi %s1683_s14, %s2094_s14   ;;  %s1638_s13 = sphi %s1681_s13, %s2093_s13   ;;  %s1634_s12 = sphi %s1679_s12, %s2092_s12  }
   0x8   : > { %s1704_s18 = sadd.s32 1, %s1646_s15   ;;  %s29_s19 = sadd.s32 1, %s1642_s14 }
   0x9   : > { %s26_s20 = ssub.s32 %s1646_s15, %s1704_s18  ;;  %p36_p0 = scmp.ne.s32.totalorder %s1642_s14, %s1638_s13 }
   0xa   : > { %p27_p1 = scmp.eq.s32.totalorder %s26_s20, 0  ;;  %p37_p2 = scmp.eq.s32.totalorder %s1646_s15, 0 }
   0xb   : > { %p42_p3 = scmp.ne.s32.totalorder %s1638_s13, %s1634_s12  ;;  %p43_p4 = scmp.eq.s32.totalorder %s1700_s16, 0 }
   0xc   : > { %s1716_s21 = scalar_select %p27_p1, %s1642_s14, %s29_s19  }
   0xd   : > { %p38_p5 = por %p37_p2, %p36_p0  ;;  %p1718_p6 = por %p43_p4, %p42_p3 }
   0xe   : > { %p118_p7 = scmp.eq.s32.totalorder %s1700_s16, 1  ;;  %p124_p8 = scmp.eq.s32.totalorder %s943_s17, 1 }
   0xf   : > { %s2076_s22 = scalar_select %p1718_p6, 1, 0 }
  0x10   : > { %p1439_p10 = scmp.lt.s32.totalorder %s1646_s15, 2  ;;  %p1725_p11 = por %p118_p7, %p36_p0 }
  0x11   : > { %p1729_p12 = por %p124_p8, %p42_p3  ;;  %s1734_s25 = sand.u32 1, %s1642_s14  }
  0x12   : > { %s2077_s23 = scalar_select %p1725_p11, 1, 0 }
  0x13   : > { %s2078_s24 = scalar_select %p1729_p12, 1, 0 }
  0x14   : > { %p1736_p13 = pnand %p1439_p10, %p38_p5  ;;  %s162_s27 = sand.u32 1, %s1646_s15  }
  0x15   : > { %s1414_s28 = smul.u32 640, %s1734_s25  ;;  %s1751_s8 = scalar_lea.sflag [#allocation6], %s162_s27 }
  0x16   : > { %s2079_s26 = scalar_select %p1736_p13, 1, 0 }
  0x17   : > { %s1415_s29 = smul.u32 10240, %s1646_s15  ;;  %s166_s30 = scalar_lea.vmem [#allocation5], %s1414_s28 }
  0x18   : > { %s173_s4 = sshll.u32 %s166_s30, 4  ;;  %p1757_p2 = pneg %p1736_p13  ;;  %s1748_s4 = int_to_ptr.vmem [resolvable:$true] %s173_s4 }
  0x19   : > { %s1746_s7 = scalar_lea.hbm %s2067_s1, %s1415_s29  ;;  %s1491_s19 = scalar_lea.hbm %s2067_s1, 20480 }
  0x1a   : > { %s1486_s9 = scalar_lea.hbm %s1746_s7, 10240  ;;  %p1492_p5 = scmp.lt.u32.totalorder %s1746_s7, %s2067_s1 }
  0x1b   : > { %p1487_p1 = scmp.ne.s32.totalorder %s1746_s7, %s1486_s9  ;;  %p1493_p7 = scmp.lt.u32.totalorder %s1491_s19, %s1486_s9 }
  0x1c   : > { %p1495_p10 = scmp.lt.u32.totalorder %s1486_s9, %s1746_s7 }
  0x1d   : > { %p1489_p3 = pnand %p1757_p2, %p1487_p1  ;;  %p1494_p8 = por %p1493_p7, %p1492_p5 }
  0x1f   : > { %p1490_p4 = pneg %p1489_p3  ;;  %p1496_p9 = por %p1495_p10, %p1494_p8 }
  0x21   : > { %p1497_p0 = pnand %p1496_p9, %p1490_p4 }
  0x23   : > { %1500 = shalt.err (!%p1497_p0)
}
  0x24   : > { %s1501_s27 = scalar_lea.vmem %s1748_s4, 10240  ;;  %s1648_s29 = smov [#allocation5]  }
  0x25   : > { %p1502_p1 = scmp.ne.s32.totalorder %s1748_s4, %s1501_s27  ;;  %s1506_s30 = sshll.u32 %s1648_s29, 4  ;;  %s1507_s30 = int_to_ptr.vmem [resolvable:$false] %s1506_s30 }
  0x26   : > { %s1508_s5 = scalar_lea.vmem %s1507_s30, 20480  ;;  %p1509_p11 = scmp.lt.s32.totalorder %s1748_s4, %s1507_s30 }
  0x27   : > { %p1504_p3 = pnand %p1502_p1, %p1757_p2  ;;  %p1510_p6 = scmp.lt.s32.totalorder %s1508_s5, %s1501_s27 }
  0x29   : > { %p1505_p12 = pneg %p1504_p3  ;;  %p1511_p5 = por %p1510_p6, %p1509_p11 }
  0x2b   : > { %p1512_p7 = pnand %p1511_p5, %p1505_p12 }
  0x2d   : > { %1515 = shalt.err (!%p1512_p7)
}
  0x2e   : > { %s1649_s6 = smov 128   ;;  %s1650_s9 = smov 8  }
  0x2f   : > { %1431 = dma.hbm_to_vmem [thread:$0]  (!%p1736_p13), %s1746_s7, 10240, %s1748_s4, %s1751_s8, %s1649_s6, %s1649_s6, %s1650_s9  }
  0x30   : > { %p199_p9 = scmp.lt.s32.totalorder %s1646_s15, 3  ;;  %s2072_s11 = sshll.u32 %s1734_s25, 3 }
  0x31   : > { %s2073_s17 = sshll.u32 %s1646_s15, 7  ;;  %p2081_p6 = scmp.ge.s32.totalorder %s1646_s15, 1 }
  0x32   : > { %s1795_s27 = scalar_lea.hbm %s2066_s0, %s2073_s17  ;;  %s148_s4 = scalar_lea.vmem [#allocation2], %s2072_s11 }
  0x33   : > { %p1786_p11 = pnand %p2081_p6, %p199_p9  ;;  %s155_s7 = sshll.u32 %s148_s4, 4  ;;  %s156_s7 = int_to_ptr.vmem [resolvable:$true] %s155_s7 }
  0x34   : > { %s145_s29 = scalar_lea.sflag [#allocation3], %s1734_s25  ;;  %s1516_s30 = scalar_lea.hbm %s1795_s27, 128 }
  0x35   : > { %s2082_s19 = scalar_select %p1786_p11, 1, 0 }
  0x36   : > { %p1517_p12 = scmp.ne.s32.totalorder %s1795_s27, %s1516_s30  ;;  %s1521_s9 = scalar_lea.hbm %s2066_s0, 256 }
  0x37   : > { %p1522_p8 = scmp.lt.u32.totalorder %s1795_s27, %s2066_s0  ;;  %p1523_p10 = scmp.lt.u32.totalorder %s1521_s9, %s1516_s30 }
  0x38   : > { %p1519_p0 = pnand %p1517_p12, %p1757_p2  ;;  %p1525_p3 = scmp.lt.u32.totalorder %s1516_s30, %s1795_s27 }
  0x39   : > { %p1524_p1 = por %p1523_p10, %p1522_p8 }
  0x3a   : > { %p1520_p4 = pneg %p1519_p0 }
  0x3b   : > { %p1526_p5 = por %p1525_p3, %p1524_p1 }
  0x3d   : > { %p1527_p7 = pnand %p1526_p5, %p1520_p4 }
  0x3f   : > { %1530 = shalt.err (!%p1527_p7)
}
  0x40   : > { %s1531_s4 = scalar_lea.vmem %s156_s7, 128  ;;  %s1651_s11 = smov [#allocation2]  }
  0x41   : > { %p1532_p9 = scmp.ne.s32.totalorder %s156_s7, %s1531_s4  ;;  %s1536_s17 = sshll.u32 %s1651_s11, 4  ;;  %s1537_s17 = int_to_ptr.vmem [resolvable:$false] %s1536_s17 }
  0x42   : > { %s1538_s5 = scalar_lea.vmem %s1537_s17, 256  ;;  %p1539_p0 = scmp.lt.s32.totalorder %s156_s7, %s1537_s17 }
  0x43   : > { %p1534_p6 = pnand %p1532_p9, %p1757_p2  ;;  %p1540_p11 = scmp.lt.s32.totalorder %s1538_s5, %s1531_s4 }
  0x45   : > { %p1535_p12 = pneg %p1534_p6  ;;  %p1541_p13 = por %p1540_p11, %p1539_p0 }
  0x47   : > { %p1542_p8 = pnand %p1541_p13, %p1535_p12 }
  0x49   : > { %1545 = shalt.err (!%p1542_p8)
}
  0x4a   : > { %p2083_p10 = scmp.ne.s32.totalorder %s2079_s26, 0  ;;  %s2084_s30 = sshll.u32 %s1646_s15, 7 }
  0x4b   : > { %s1822_s20 = scalar_lea.hbm %s2068_s2, %s2084_s30  ;;  %s2085_s11 = sshll.u32 %s1734_s25, 3 }
  0x4c   : > { %1428 = dma.hbm_to_vmem [thread:$0]  (!%p2083_p10), %s1795_s27, 128, %s156_s7, %s145_s29  }
  0x4d   : > { %s187_s17 = scalar_lea.vmem [#allocation7], %s2085_s11  ;;  %s1546_s4 = scalar_lea.hbm %s1822_s20, 128 }
  0x4e   : > { %s194_s28 = sshll.u32 %s187_s17, 4  ;;  %p1547_p13 = scmp.ne.s32.totalorder %s1822_s20, %s1546_s4  ;;  %s195_s28 = int_to_ptr.vmem [resolvable:$true] %s194_s28 }
  0x4f   : > { %s1551_s29 = scalar_lea.hbm %s2068_s2, 256  ;;  %p1552_p1 = scmp.lt.u32.totalorder %s1822_s20, %s2068_s2 }
  0x50   : > { %p1549_p11 = pnand %p1547_p13, %p1757_p2  ;;  %p1553_p3 = scmp.lt.u32.totalorder %s1551_s29, %s1546_s4 }
  0x51   : > { %p1555_p7 = scmp.lt.u32.totalorder %s1546_s4, %s1822_s20 }
  0x52   : > { %p1550_p4 = pneg %p1549_p11  ;;  %p1554_p5 = por %p1553_p3, %p1552_p1 }
  0x54   : > { %p1556_p9 = por %p1555_p7, %p1554_p5 }
  0x56   : > { %p1557_p6 = pnand %p1556_p9, %p1550_p4 }
  0x58   : > { %1560 = shalt.err (!%p1557_p6)
}
  0x59   : > { %s1561_s25 = scalar_lea.vmem %s195_s28, 128  ;;  %s1652_s6 = smov [#allocation7]  }
  0x5a   : > { %p1562_p12 = scmp.ne.s32.totalorder %s195_s28, %s1561_s25  ;;  %s1566_s9 = sshll.u32 %s1652_s6, 4  ;;  %s1567_s9 = int_to_ptr.vmem [resolvable:$false] %s1566_s9 }
  0x5b   : > { %s1568_s11 = scalar_lea.vmem %s1567_s9, 256  ;;  %p1569_p13 = scmp.lt.s32.totalorder %s195_s28, %s1567_s9 }
  0x5c   : > { %p1564_p0 = pnand %p1562_p12, %p1757_p2  ;;  %p1570_p11 = scmp.lt.s32.totalorder %s1568_s11, %s1561_s25 }
  0x5e   : > { %p1565_p8 = pneg %p1564_p0  ;;  %p1571_p10 = por %p1570_p11, %p1569_p13 }
  0x60   : > { %p1572_p1 = pnand %p1571_p10, %p1565_p8 }
  0x62   : > { %1575 = shalt.err (!%p1572_p1)
}
  0x63   : > { %p2086_p3 = scmp.ne.s32.totalorder %s2079_s26, 0  ;;  %p2087_p4 = scmp.ne.s32.totalorder %s2082_s19, 0 }
  0x64   : > { %s1847_s10 = sand.u32 (!%p2087_p4), 1, %s1638_s13   ;;  %p2088_p2 = scmp.ne.s32.totalorder (!%p2087_p4), %s2076_s22, 0 }
  0x65   : > { %1434 = dma.hbm_to_vmem [thread:$0]  (!%p2086_p3), %s1822_s20, 128, %s195_s28, %s1751_s8  }
  0x66   : > { %203 = sbr.rel (%p2087_p4) target bundleno = 1350 (0x546), region = 32  ;;  %s952_s17 = sshll.u32 (!%p2087_p4), %s1847_s10, 3 }
  0x67   : > { %s206_s4 = scalar_lea.sflag (!%p2087_p4), [#allocation3], %s1847_s10  ;;  %s1853_s27 = scalar_lea.vmem (!%p2087_p4), [#allocation2], %s952_s17 }
  0x6d   : > { %1621 = dma.done.wait (%p2088_p2), %s206_s4, 128  }
  0x6e   : > { %1623 = vsyncadd (%p2088_p2), %s206_s4, 4294967168  ;;  %s214_s26 = sand.u32 1, %s1700_s16   ;;  %s1416_s8 = smul.u32 640, %s1847_s10 }
  0x6f   : > { %s215_s19 = scalar_lea.sflag [#allocation6], %s214_s26 }
  0x70   : > { %s1861_s20 = scalar_lea.vmem [#allocation5], %s1416_s8 }
  0x71   : > { %1625 = dma.done.wait (%p2088_p2), %s215_s19, 10368  }
  0x72   : > { %1627 = vsyncadd (%p2088_p2), %s215_s19, 4294956928  ;;  %v1653_v0 = vmov 0.0|0.0   ;;  %vm1654_vm0 = vmmov 0   ;;  %v1655_v1 = vmov 0.0   ;;  %v261_v2 = vld [vmem:[%s1861_s20] sm:$0xff]  ;;  %v262_v3 = vld [vmem:[%s1861_s20 + $0x8] sm:$0xff] }
  0x73   : > { %1294 = vmatprep.subr.bf16.mxu0 %v1653_v0  ;;  %1151 = vmatprep.mubr.msk.f32.mxu0 %vm1654_vm0, %v1655_v1  ;;  %v263_v4 = vld [vmem:[%s1861_s20 + $0x10] sm:$0xff]  ;;  %v1295_v5 = vpack.c.bf16 %v262_v3, %v261_v2  ;;  %v264_v6 = vld [vmem:[%s1861_s20 + $0x18] sm:$0xff]  ;;  %v265_v8 = vld [vmem:[%s1861_s20 + $0x20] sm:$0xff]  ;;  %s1926_s22 = scalar_lea.vmem [#allocation7], %s952_s17  ;;  %s954_s28 = sshll.u32 %s1847_s10, 4 }
  0x74   : > { %1318 = vmatprep.subr.bf16.mxu1 %v1653_v0  ;;  %1186 = vmatprep.mubr.msk.f32.mxu1 %vm1654_vm0, %v1655_v1  ;;  %v1298_v7 = vpack.c.bf16 %v264_v6, %v263_v4  ;;  %v266_v9 = vld [vmem:[%s1861_s20 + $0x28] sm:$0xff]  ;;  %v267_v11 = vld [vmem:[%s1861_s20 + $0x30] sm:$0xff]  ;;  %v268_v12 = vld [vmem:[%s1861_s20 + $0x38] sm:$0xff]  ;;  %s1985_s7 = scalar_lea.vmem [#allocation8], %s954_s28  ;;  %s1033_s5 = sshll.u32 %s1700_s16, 8 }
  0x75   : > { %1296 = vmatpush3.bf16.msra.mxu0 %v1295_v5  ;;  %v1301_v10 = vpack.c.bf16 %v266_v9, %v265_v8  ;;  %v1304_v13 = vpack.c.bf16 %v268_v12, %v267_v11  ;;  %v269_v14 = vld [vmem:[%s1861_s20 + $0x40] sm:$0xff]  ;;  %v270_v15 = vld [vmem:[%s1861_s20 + $0x48] sm:$0xff]  ;;  %v271_v17 = vld [vmem:[%s1861_s20 + $0x50] sm:$0xff]  ;;  %s827_s29 = sshll.u32 %s1985_s7, 4  ;;  %s2021_s6 = scalar_lea.hbm %s2069_s3, %s1033_s5  ;;  %s2016_s29 = int_to_ptr.vmem [resolvable:$true] %s827_s29 }
  0x76   : > { %1297 = vmatprep.subr.bf16.mxu0 %v1653_v0  ;;  %v1307_v16 = vpack.c.bf16 %v270_v15, %v269_v14  ;;  %v272_v18 = vld [vmem:[%s1861_s20 + $0x58] sm:$0xff]  ;;  %v273_v20 = vld [vmem:[%s1861_s20 + $0x60] sm:$0xff]  ;;  %v274_v21 = vld [vmem:[%s1861_s20 + $0x68] sm:$0xff]  ;;  %s814_s9 = scalar_lea.sflag [#allocation4], %s1847_s10  ;;  %s1576_s11 = scalar_lea.vmem %s2016_s29, 256 }
  0x77   : > { %v1310_v19 = vpack.c.bf16 %v272_v18, %v271_v17  ;;  %v1313_v22 = vpack.c.bf16 %v274_v21, %v273_v20  ;;  %v275_v23 = vld [vmem:[%s1861_s20 + $0x70] sm:$0xff]  ;;  %v276_v24 = vld [vmem:[%s1861_s20 + $0x78] sm:$0xff]  ;;  %v957_v27 = vld [vmem:[%s1861_s20 + $0x80] sm:$0xff]  ;;  %p1577_p10 = scmp.ne.s32.totalorder %s2016_s29, %s1576_s11  ;;  %p2089_p5 = scmp.ne.s32.totalorder %s2077_s23, 0 }
  0x78   : > { %v1316_v25 = vpack.c.bf16 %v276_v24, %v275_v23  ;;  %v260_v26 = vld [vmem:[%s1853_s27] sm:$0xff]  ;;  %v958_v28 = vld [vmem:[%s1861_s20 + $0x88] sm:$0xff]  ;;  %v961_v33 = vld [vmem:[%s1861_s20 + $0xa0] sm:$0xff]  ;;  %s1656_s16 = smov [#allocation8]  }
  0x79   : > { %1299 = vmatpush3.bf16.msra.mxu0 %v1298_v7  ;;  %v1319_v29 = vpack.c.bf16 %v958_v28, %v957_v27  ;;  %v959_v30 = vld [vmem:[%s1861_s20 + $0x90] sm:$0xff]  ;;  %v960_v31 = vld [vmem:[%s1861_s20 + $0x98] sm:$0xff]  ;;  %v962_v34 = vld [vmem:[%s1861_s20 + $0xa8] sm:$0xff]  ;;  %p1578_p7 = pnand %p1577_p10, %p2089_p5  ;;  %s1580_s17 = sshll.u32 %s1656_s16, 4  ;;  %s1581_s17 = int_to_ptr.vmem [resolvable:$false] %s1580_s17 }
  0x7a   : > { %1300 = vmatprep.subr.bf16.mxu0 %v1653_v0  ;;  %v1322_v32 = vpack.c.bf16 %v960_v31, %v959_v30  ;;  %v1325_v35 = vpack.c.bf16 %v962_v34, %v961_v33  ;;  %v963_v36 = vld [vmem:[%s1861_s20 + $0xb0] sm:$0xff]  ;;  %v964_v37 = vld [vmem:[%s1861_s20 + $0xb8] sm:$0xff]  ;;  %v965_v39 = vld [vmem:[%s1861_s20 + $0xc0] sm:$0xff]  ;;  %s1582_s4 = scalar_lea.vmem %s1581_s17, 512  ;;  %p1583_p6 = scmp.lt.s32.totalorder %s2016_s29, %s1581_s17 }
  0x7b   : > { %1320 = vmatpush3.bf16.msra.mxu1 %v1319_v29  ;;  %v1328_v38 = vpack.c.bf16 %v964_v37, %v963_v36  ;;  %v966_v40 = vld [vmem:[%s1861_s20 + $0xc8] sm:$0xff]  ;;  %v967_v42 = vld [vmem:[%s1861_s20 + $0xd0] sm:$0xff]  ;;  %v968_v43 = vld [vmem:[%s1861_s20 + $0xd8] sm:$0xff]  ;;  %p1579_p9 = pneg %p1578_p7  ;;  %p1584_p12 = scmp.lt.s32.totalorder %s1582_s4, %s1576_s11 }
  0x7c   : > { %1321 = vmatprep.subr.bf16.mxu1 %v1653_v0  ;;  %v1331_v41 = vpack.c.bf16 %v966_v40, %v965_v39  ;;  %v1334_v44 = vpack.c.bf16 %v968_v43, %v967_v42  ;;  %v969_v45 = vld [vmem:[%s1861_s20 + $0xe0] sm:$0xff]  ;;  %v970_v46 = vld [vmem:[%s1861_s20 + $0xe8] sm:$0xff]  ;;  %v971_v48 = vld [vmem:[%s1861_s20 + $0xf0] sm:$0xff] }
  0x7d   : > { %1302 = vmatpush3.bf16.msra.mxu0 %v1301_v10  ;;  %v1337_v47 = vpack.c.bf16 %v970_v46, %v969_v45  ;;  %v972_v49 = vld [vmem:[%s1861_s20 + $0xf8] sm:$0xff]  ;;  %v955_v12 = vld [vmem:[%s1926_s22] ss:$0 sm:$0xff]  ;;  %v956_v14 = vld [vmem:[%s1926_s22 + $0x1] ss:$0 sm:$0xff]  ;;  %p1585_p0 = por %p1584_p12, %p1583_p6 }
  0x7e   : > { %1303 = vmatprep.subr.bf16.mxu0 %v1653_v0  ;;  %v1340_v50 = vpack.c.bf16 %v972_v49, %v971_v48  ;;  %v975_v18 = vld [vmem:[%s1861_s20 + $0x100] sm:$0xff]  ;;  %v977_v21 = vld [vmem:[%s1861_s20 + $0x110] sm:$0xff]  ;;  %v982_v28 = vld [vmem:[%s1861_s20 + $0x138] sm:$0xff] }
  0x7f   : > { %1323 = vmatpush3.bf16.msra.mxu1 %v1322_v32  ;;  %v979_v24 = vld [vmem:[%s1861_s20 + $0x120] sm:$0xff]  ;;  %v981_v27 = vld [vmem:[%s1861_s20 + $0x130] sm:$0xff]  ;;  %v984_v31 = vld [vmem:[%s1861_s20 + $0x148] sm:$0xff]  ;;  %p1586_p8 = pnand %p1585_p0, %p1579_p9 }
  0x80   : > { %1324 = vmatprep.subr.bf16.mxu1 %v1653_v0  ;;  %v1352_v29 = vpack.c.bf16 %v982_v28, %v981_v27  ;;  %v983_v30 = vld [vmem:[%s1861_s20 + $0x140] sm:$0xff]  ;;  %v985_v33 = vld [vmem:[%s1861_s20 + $0x150] sm:$0xff]  ;;  %v986_v34 = vld [vmem:[%s1861_s20 + $0x158] sm:$0xff] }
  0x81   : > { %1305 = vmatpush3.bf16.msra.mxu0 %v1304_v13  ;;  %v1355_v32 = vpack.c.bf16 %v984_v31, %v983_v30  ;;  %v987_v36 = vld [vmem:[%s1861_s20 + $0x160] sm:$0xff]  ;;  %v988_v37 = vld [vmem:[%s1861_s20 + $0x168] sm:$0xff]  ;;  %v989_v39 = vld [vmem:[%s1861_s20 + $0x170] sm:$0xff] }
  0x82   : > { %1306 = vmatprep.subr.bf16.mxu0 %v1653_v0  ;;  %v990_v40 = vld [vmem:[%s1861_s20 + $0x178] sm:$0xff]  ;;  %v992_v42 = vld [vmem:[%s1861_s20 + $0x180] sm:$0xff]  ;;  %v993_v43 = vld [vmem:[%s1861_s20 + $0x188] sm:$0xff] }
  0x83   : > { %1326 = vmatpush3.bf16.msra.mxu1 %v1325_v35  ;;  %v1358_v35 = vpack.c.bf16 %v986_v34, %v985_v33  ;;  %v1367_v45 = vpack.c.bf16 %v993_v43, %v992_v42  ;;  %v995_v46 = vld [vmem:[%s1861_s20 + $0x198] sm:$0xff]  ;;  %v996_v48 = vld [vmem:[%s1861_s20 + $0x1a0] sm:$0xff]  ;;  %v997_v49 = vld [vmem:[%s1861_s20 + $0x1a8] sm:$0xff] }
  0x84   : > { %1327 = vmatprep.subr.bf16.mxu1 %v1653_v0  ;;  %v1006_v30 = vld [vmem:[%s1861_s20 + $0x1f0] sm:$0xff]  ;;  %v1007_v31 = vld [vmem:[%s1861_s20 + $0x1f8] sm:$0xff]  ;;  %v991_v33 = vld [vmem:[%s1926_s22 + $0x4] ss:$0 sm:$0xff] }
  0x85   : > { %1308 = vmatpush3.bf16.msra.mxu0 %v1307_v16  ;;  %v1014_v42 = vld [vmem:[%s1861_s20 + $0x220] sm:$0xff]  ;;  %v1015_v43 = vld [vmem:[%s1861_s20 + $0x228] sm:$0xff] }
  0x86   : > { %1309 = vmatprep.subr.bf16.mxu0 %v1653_v0 }
  0x87   : > { %1329 = vmatpush3.bf16.msra.mxu1 %v1328_v38  ;;  %v1361_v38 = vpack.c.bf16 %v988_v37, %v987_v36  ;;  %v1011_v37 = vld [vmem:[%s1861_s20 + $0x208] sm:$0xff] }
  0x88   : > { %1330 = vmatprep.subr.bf16.mxu1 %v1653_v0 }
  0x89   : > { %1311 = vmatpush3.bf16.msra.mxu0 %v1310_v19  ;;  %v976_v19 = vld [vmem:[%s1861_s20 + $0x108] sm:$0xff] }
  0x8a   : > { %1312 = vmatprep.subr.bf16.mxu0 %v1653_v0  ;;  %v1343_v20 = vpack.c.bf16 %v976_v19, %v975_v18 }
  0x8b   : > { %1332 = vmatpush3.bf16.msra.mxu1 %v1331_v41  ;;  %v1364_v41 = vpack.c.bf16 %v990_v40, %v989_v39  ;;  %v1012_v39 = vld [vmem:[%s1861_s20 + $0x210] sm:$0xff]  ;;  %v1013_v40 = vld [vmem:[%s1861_s20 + $0x218] sm:$0xff] }
  0x8c   : > { %1333 = vmatprep.subr.bf16.mxu1 %v1653_v0 }
  0x8d   : > { %1314 = vmatpush3.bf16.msra.mxu0 %v1313_v22  ;;  %v978_v22 = vld [vmem:[%s1861_s20 + $0x118] sm:$0xff] }
  0x8e   : > { %1315 = vmatprep.subr.bf16.mxu0 %v1653_v0  ;;  %v1346_v23 = vpack.c.bf16 %v978_v22, %v977_v21 }
  0x8f   : > { %1335 = vmatpush3.bf16.msra.mxu1 %v1334_v44  ;;  %v994_v44 = vld [vmem:[%s1861_s20 + $0x190] sm:$0xff] }
  0x90   : > { %1336 = vmatprep.subr.bf16.mxu1 %v1653_v0 }
  0x91   : > { %1317 = vmatpush3.bf16.msra.mxu0 %v1316_v25  ;;  %v980_v25 = vld [vmem:[%s1861_s20 + $0x128] sm:$0xff] }
  0x92   : > { %1342 = vmatprep.subr.bf16.mxu0 %v1653_v0 }
  0x93   : > { %1338 = vmatpush3.bf16.msra.mxu1 %v1337_v47  ;;  %v1370_v47 = vpack.c.bf16 %v995_v46, %v994_v44  ;;  %v1397_v44 = vpack.c.bf16 %v1015_v43, %v1014_v42  ;;  %v1017_v46 = vld [vmem:[%s1861_s20 + $0x238] sm:$0xff] }
  0x94   : > { %1152 = vmatmul.mubr.f32.vlgmr.msra.gmra.mrb[0].mxu0 %v260_v26  ;;  %1339 = vmatprep.subr.bf16.mxu1 %v1653_v0  ;;  %v1349_v26 = vpack.c.bf16 %v980_v25, %v979_v24  ;;  %v973_v24 = vld [vmem:[%s1926_s22 + $0x2] ss:$0 sm:$0xff] }
  0x95   : > { %1221 = vmatprep.mubr.msk.f32.mxu0 %vm1654_vm0, %v1655_v1  ;;  %1344 = vmatpush3.bf16.msra.mxu0 %v1343_v20 }
  0x96   : > { %1345 = vmatprep.subr.bf16.mxu0 %v1653_v0 }
  0x97   : > { %1341 = vmatpush3.bf16.msra.mxu1 %v1340_v50  ;;  %v1373_v50 = vpack.c.bf16 %v997_v49, %v996_v48  ;;  %v1018_v48 = vld [vmem:[%s1861_s20 + $0x240] sm:$0xff]  ;;  %v1019_v49 = vld [vmem:[%s1861_s20 + $0x248] sm:$0xff] }
  0x98   : > { %1366 = vmatprep.subr.bf16.mxu1 %v1653_v0 }
  0x99   : > { %1347 = vmatpush3.bf16.msra.mxu0 %v1346_v23 }
  0x9a   : > { %1348 = vmatprep.subr.bf16.mxu0 %v1653_v0 }
  0x9d   : > { %1350 = vmatpush3.bf16.msra.mxu0 %v1349_v26  ;;  %v974_v26 = vld [vmem:[%s1926_s22 + $0x3] ss:$0 sm:$0xff] }
  0x9e   : > { %1351 = vmatprep.subr.bf16.mxu0 %v1653_v0 }
  0xa1   : > { %1353 = vmatpush3.bf16.msra.mxu0 %v1352_v29 }
  0xa2   : > { %1354 = vmatprep.subr.bf16.mxu0 %v1653_v0 }
  0xa5   : > { %1356 = vmatpush3.bf16.msra.mxu0 %v1355_v32  ;;  %v1388_v32 = vpack.c.bf16 %v1007_v31, %v1006_v30 }
  0xa6   : > { %1357 = vmatprep.subr.bf16.mxu0 %v1653_v0 }
  0xa9   : > { %1359 = vmatpush3.bf16.msra.mxu0 %v1358_v35 }
  0xaa   : > { %1360 = vmatprep.subr.bf16.mxu0 %v1653_v0 }
  0xad   : > { %1362 = vmatpush3.bf16.msra.mxu0 %v1361_v38 }
  0xae   : > { %1363 = vmatprep.subr.bf16.mxu0 %v1653_v0 }
  0xb1   : > { %1365 = vmatpush3.bf16.msra.mxu0 %v1364_v41  ;;  %v1394_v41 = vpack.c.bf16 %v1013_v40, %v1012_v39 }
  0xb2   : > { %1390 = vmatprep.subr.bf16.mxu0 %v1653_v0 }
 0x167   : > { %v343_v51 = vpop.f32.mrb[0].mxu0 }
 0x168   : > { %v349_v52 = vrot.slane %v343_v51, 4  ;;  %v355_v53 = vmul.f32 %v343_v51, %v343_v51  ;;  %v1153_v54 = vpop.f32.mrb[1].mxu0 }
 0x169   : > { %v1000_v54 = vld [vmem:[%s1861_s20 + $0x1c0] sm:$0xff] }
 0x16a   : > { %v350_v55 = vadd.f32 %v349_v52, %v343_v51  ;;  %v356_v56 = vrot.slane %v355_v53, 4  ;;  %v999_v52 = vld [vmem:[%s1861_s20 + $0x1b8] sm:$0xff] }
 0x16c   : > { %v351_v57 = vrot.slane %v350_v55, 2  ;;  %v357_v58 = vadd.f32 %v356_v56, %v355_v53 }
 0x16e   : > { %v352_v59 = vadd.f32 %v351_v57, %v350_v55  ;;  %v358_v60 = vrot.slane %v357_v58, 2  ;;  %v1001_v55 = vld [vmem:[%s1861_s20 + $0x1c8] sm:$0xff]  ;;  %v1002_v57 = vld [vmem:[%s1861_s20 + $0x1d0] sm:$0xff] }
 0x16f   : > { %v1379_v56 = vpack.c.bf16 %v1001_v55, %v1000_v54  ;;  %v1022_v54 = vld [vmem:[%s1861_s20 + $0x260] sm:$0xff]  ;;  %v1023_v55 = vld [vmem:[%s1861_s20 + $0x268] sm:$0xff] }
 0x170   : > { %v353_v61 = vrot.slane %v352_v59, 1  ;;  %v359_v62 = vadd.f32 %v358_v60, %v357_v58  ;;  %v1003_v58 = vld [vmem:[%s1861_s20 + $0x1d8] sm:$0xff]  ;;  %v1004_v60 = vld [vmem:[%s1861_s20 + $0x1e0] sm:$0xff] }
 0x172   : > { %v354_v63 = vadd.f32 %v353_v61, %v352_v59  ;;  %v360_v2 = vrot.slane %v359_v62, 1  ;;  %v1382_v59 = vpack.c.bf16 %v1003_v58, %v1002_v57  ;;  %v1005_v61 = vld [vmem:[%s1861_s20 + $0x1e8] sm:$0xff]  ;;  %v1024_v57 = vld [vmem:[%s1861_s20 + $0x270] sm:$0xff]  ;;  %v1025_v58 = vld [vmem:[%s1861_s20 + $0x278] sm:$0xff] }
 0x174   : > { %v361_v3 = vadd.f32 %v360_v2, %v359_v62  ;;  %v362_v4 = vmul.f32 0.125, %v354_v63  ;;  %v1385_v62 = vpack.c.bf16 %v1005_v61, %v1004_v60 }
 0x176   : > { %v363_v5 = vmul.f32 0.125, %v361_v3  ;;  %v364_v6 = vmul.f32 %v362_v4, %v362_v4  ;;  %v367_v10 = vsub.f32 %v343_v51, %v362_v4  ;;  %v998_v51 = vld [vmem:[%s1861_s20 + $0x1b0] sm:$0xff] }
 0x177   : > { %v1376_v53 = vpack.c.bf16 %v999_v52, %v998_v51  ;;  %v1020_v51 = vld [vmem:[%s1861_s20 + $0x250] sm:$0xff]  ;;  %v1021_v52 = vld [vmem:[%s1861_s20 + $0x258] sm:$0xff] }
 0x178   : > { %v365_v7 = vsub.f32 %v363_v5, %v364_v6 }
 0x17a   : > { %v366_v8 = vmax.f32 %v365_v7, 0.0 }
 0x17c   : > { %v368_v9 = vadd.f32 1e-05, %v366_v8 }
 0x17e   : > { %1480 = vrsqrt.f32 %v368_v9 }
 0x188   : > { %v1481_v11 = vpop.eup %1480 }
 0x189   : > { %v370_v13 = vmul.f32 %v1481_v11, %v367_v10 }
 0x18b   : > { %v375_v15 = vmul.f32 %v955_v12, %v370_v13 }
 0x18d   : > { %v380_v16 = vadd.f32 %v956_v14, %v375_v15 }
 0x18f   : > { %v381_v17 = vmax.f32 %v380_v16, 0.0 }
 0x191   : > { %1187 = vmatmul.mubr.f32.vlgmr.msra.gmra.mrb[0].mxu1 %v381_v17 }
 0x192   : > { %1256 = vmatprep.mubr.msk.f32.mxu1 %vm1654_vm0, %v1655_v1  ;;  %1368 = vmatpush3.bf16.msra.mxu1 %v1367_v45  ;;  %v1016_v45 = vld [vmem:[%s1861_s20 + $0x230] sm:$0xff] }
 0x193   : > { %1369 = vmatprep.subr.bf16.mxu1 %v1653_v0 }
 0x196   : > { %1371 = vmatpush3.bf16.msra.mxu1 %v1370_v47  ;;  %v1400_v47 = vpack.c.bf16 %v1017_v46, %v1016_v45 }
 0x197   : > { %1372 = vmatprep.subr.bf16.mxu1 %v1653_v0 }
 0x19a   : > { %1374 = vmatpush3.bf16.msra.mxu1 %v1373_v50  ;;  %v1403_v50 = vpack.c.bf16 %v1019_v49, %v1018_v48 }
 0x19b   : > { %1375 = vmatprep.subr.bf16.mxu1 %v1653_v0 }
 0x19e   : > { %1377 = vmatpush3.bf16.msra.mxu1 %v1376_v53  ;;  %v1406_v53 = vpack.c.bf16 %v1021_v52, %v1020_v51 }
 0x19f   : > { %1378 = vmatprep.subr.bf16.mxu1 %v1653_v0 }
 0x1a2   : > { %1380 = vmatpush3.bf16.msra.mxu1 %v1379_v56  ;;  %v1409_v56 = vpack.c.bf16 %v1023_v55, %v1022_v54 }
 0x1a3   : > { %1381 = vmatprep.subr.bf16.mxu1 %v1653_v0 }
 0x1a6   : > { %1383 = vmatpush3.bf16.msra.mxu1 %v1382_v59  ;;  %v1412_v59 = vpack.c.bf16 %v1025_v58, %v1024_v57 }
 0x1a7   : > { %1384 = vmatprep.subr.bf16.mxu1 %v1653_v0 }
 0x1aa   : > { %1386 = vmatpush3.bf16.msra.mxu1 %v1385_v62 }
 0x1ab   : > { %1387 = vmatprep.subr.bf16.mxu1 %v1653_v0 }
 0x1ae   : > { %1389 = vmatpush3.bf16.msra.mxu1 %v1388_v32 }
 0x264   : > { %v465_v63 = vpop.f32.mrb[0].mxu1 }
 0x265   : > { %v471_v2 = vrot.slane %v465_v63, 4  ;;  %v477_v3 = vmul.f32 %v465_v63, %v465_v63  ;;  %v1188_v4 = vpop.f32.mrb[1].mxu1 }
 0x267   : > { %v472_v5 = vadd.f32 %v471_v2, %v465_v63  ;;  %v478_v6 = vrot.slane %v477_v3, 4 }
 0x269   : > { %v473_v7 = vrot.slane %v472_v5, 2  ;;  %v479_v8 = vadd.f32 %v478_v6, %v477_v3 }
 0x26b   : > { %v474_v9 = vadd.f32 %v473_v7, %v472_v5  ;;  %v480_v10 = vrot.slane %v479_v8, 2 }
 0x26d   : > { %v475_v11 = vrot.slane %v474_v9, 1  ;;  %v481_v12 = vadd.f32 %v480_v10, %v479_v8 }
 0x26f   : > { %v476_v13 = vadd.f32 %v475_v11, %v474_v9  ;;  %v482_v14 = vrot.slane %v481_v12, 1 }
 0x271   : > { %v483_v15 = vadd.f32 %v482_v14, %v481_v12  ;;  %v484_v16 = vmul.f32 0.125, %v476_v13 }
 0x273   : > { %v485_v17 = vmul.f32 0.125, %v483_v15  ;;  %v486_v18 = vmul.f32 %v484_v16, %v484_v16  ;;  %v489_v22 = vsub.f32 %v465_v63, %v484_v16 }
 0x275   : > { %v487_v19 = vsub.f32 %v485_v17, %v486_v18 }
 0x277   : > { %v488_v20 = vmax.f32 %v487_v19, 0.0 }
 0x279   : > { %v490_v21 = vadd.f32 1e-05, %v488_v20  ;;  %v1008_v20 = vld [vmem:[%s1926_s22 + $0x5] ss:$0 sm:$0xff] }
 0x27b   : > { %1482 = vrsqrt.f32 %v490_v21 }
 0x285   : > { %v1483_v23 = vpop.eup %1482 }
 0x286   : > { %v492_v25 = vmul.f32 %v1483_v23, %v489_v22  ;;  %v1009_v22 = vld [vmem:[%s1926_s22 + $0x6] ss:$0 sm:$0xff] }
 0x288   : > { %v497_v27 = vmul.f32 %v973_v24, %v492_v25 }
 0x28a   : > { %v502_v28 = vadd.f32 %v974_v26, %v497_v27  ;;  %v1026_v26 = vld [vmem:[%s1926_s22 + $0x7] ss:$0 sm:$0xff] }
 0x28c   : > { %v503_v29 = vmax.f32 %v502_v28, 0.0 }
 0x28e   : > { %1222 = vmatmul.mubr.f32.vlgmr.msra.gmra.mrb[2].mxu0 %v503_v29 }
 0x28f   : > { %1291 = vmatprep.mubr.msk.f32.mxu0 %vm1654_vm0, %v1655_v1  ;;  %v1010_v1 = vld [vmem:[%s1861_s20 + $0x200] sm:$0xff] }
 0x290   : > { %v1391_v38 = vpack.c.bf16 %v1011_v37, %v1010_v1 }
 0x292   : > { %1392 = vmatpush3.bf16.msra.mxu0 %v1391_v38 }
 0x293   : > { %1393 = vmatprep.subr.bf16.mxu0 %v1653_v0 }
 0x296   : > { %1395 = vmatpush3.bf16.msra.mxu0 %v1394_v41 }
 0x297   : > { %1396 = vmatprep.subr.bf16.mxu0 %v1653_v0 }
 0x29a   : > { %1398 = vmatpush3.bf16.msra.mxu0 %v1397_v44 }
 0x29b   : > { %1399 = vmatprep.subr.bf16.mxu0 %v1653_v0 }
 0x29e   : > { %1401 = vmatpush3.bf16.msra.mxu0 %v1400_v47 }
 0x29f   : > { %1402 = vmatprep.subr.bf16.mxu0 %v1653_v0 }
 0x2a2   : > { %1404 = vmatpush3.bf16.msra.mxu0 %v1403_v50 }
 0x2a3   : > { %1405 = vmatprep.subr.bf16.mxu0 %v1653_v0 }
 0x2a6   : > { %1407 = vmatpush3.bf16.msra.mxu0 %v1406_v53 }
 0x2a7   : > { %1408 = vmatprep.subr.bf16.mxu0 %v1653_v0 }
 0x2aa   : > { %1410 = vmatpush3.bf16.msra.mxu0 %v1409_v56 }
 0x2ab   : > { %1411 = vmatprep.subr.bf16.mxu0 %v1653_v0 }
 0x2ae   : > { %1413 = vmatpush3.bf16.msra.mxu0 %v1412_v59 }
 0x361   : > { %v592_v34 = vpop.f32.mrb[2].mxu0 }
 0x362   : > { %v593_v35 = vadd.f32 %v991_v33, %v592_v34  ;;  %v1223_v36 = vpop.f32.mrb[3].mxu0 }
 0x364   : > { %810 = vst [vmem:[%s1985_s7] sm:$0xff] %v593_v35  ;;  %1257 = vmatmul.mubr.f32.vlgmr.msra.gmra.mrb[2].mxu1 %v593_v35 }
 0x437   : > { %v679_v60 = vpop.f32.mrb[2].mxu1 }
 0x438   : > { %v685_v61 = vrot.slane %v679_v60, 4  ;;  %v691_v62 = vmul.f32 %v679_v60, %v679_v60  ;;  %v1258_v63 = vpop.f32.mrb[3].mxu1 }
 0x43a   : > { %v686_v2 = vadd.f32 %v685_v61, %v679_v60  ;;  %v692_v3 = vrot.slane %v691_v62, 4 }
 0x43c   : > { %v687_v4 = vrot.slane %v686_v2, 2  ;;  %v693_v5 = vadd.f32 %v692_v3, %v691_v62 }
 0x43e   : > { %v688_v6 = vadd.f32 %v687_v4, %v686_v2  ;;  %v694_v7 = vrot.slane %v693_v5, 2 }
 0x440   : > { %v689_v8 = vrot.slane %v688_v6, 1  ;;  %v695_v9 = vadd.f32 %v694_v7, %v693_v5 }
 0x442   : > { %v690_v10 = vadd.f32 %v689_v8, %v688_v6  ;;  %v696_v0 = vrot.slane %v695_v9, 1 }
 0x444   : > { %v697_v11 = vadd.f32 %v696_v0, %v695_v9  ;;  %v698_v12 = vmul.f32 0.125, %v690_v10 }
 0x446   : > { %v699_v13 = vmul.f32 0.125, %v697_v11  ;;  %v700_v14 = vmul.f32 %v698_v12, %v698_v12  ;;  %v703_v18 = vsub.f32 %v679_v60, %v698_v12 }
 0x448   : > { %v701_v15 = vsub.f32 %v699_v13, %v700_v14 }
 0x44a   : > { %v702_v16 = vmax.f32 %v701_v15, 0.0 }
 0x44c   : > { %v704_v17 = vadd.f32 1e-05, %v702_v16 }
 0x44e   : > { %1484 = vrsqrt.f32 %v704_v17 }
 0x458   : > { %v1485_v19 = vpop.eup %1484 }
 0x459   : > { %v706_v21 = vmul.f32 %v1485_v19, %v703_v18 }
 0x45b   : > { %v711_v23 = vmul.f32 %v1008_v20, %v706_v21 }
 0x45d   : > { %v716_v24 = vadd.f32 %v1009_v22, %v711_v23 }
 0x45f   : > { %v717_v25 = vmax.f32 %v716_v24, 0.0 }
 0x461   : > { %1292 = vmatmul.mubr.f32.vlgmr.msra.gmra.mrb[4].mxu0 %v717_v25 }
 0x534   : > { %v806_v27 = vpop.f32.mrb[4].mxu0 }
 0x535   : > { %v807_v28 = vadd.f32 %v1026_v26, %v806_v27  ;;  %v1293_v29 = vpop.f32.mrb[5].mxu0 }
 0x537   : > { %1027 = vst [vmem:[%s1985_s7 + $0x8] sm:$0xff] %v807_v28 }
 0x538   : > { %1589 = shalt.err (!%p1586_p8)
}
 0x539   : > { %s1590_s27 = scalar_lea.hbm %s2021_s6, 256  ;;  %s1594_s19 = scalar_lea.hbm %s2069_s3, 512 }
 0x53a   : > { %p1591_p13 = scmp.ne.s32.totalorder %s2021_s6, %s1590_s27  ;;  %p1595_p3 = scmp.lt.u32.totalorder %s2021_s6, %s2069_s3 }
 0x53b   : > { %p1596_p4 = scmp.lt.u32.totalorder %s1594_s19, %s1590_s27  ;;  %p1598_p10 = scmp.lt.u32.totalorder %s1590_s27, %s2021_s6 }
 0x53c   : > { %p1592_p11 = pnand %p1591_p13, %p2089_p5 }
 0x53d   : > { %p1597_p2 = por %p1596_p4, %p1595_p3 }
 0x53e   : > { %p1593_p1 = pneg %p1592_p11 }
 0x53f   : > { %p1599_p7 = por %p1598_p10, %p1597_p2 }
 0x541   : > { %p1600_p9 = pnand %p1599_p7, %p1593_p1 }
 0x543   : > { %1603 = shalt.err (!%p1600_p9)
}
 0x544   : > { %s1657_s28 = smov 128   ;;  %s1658_s7 = smov 8  }
 0x545   : > { %1423 = dma.vmem_to_hbm [thread:$0]  (%p2089_p5), %s2016_s29, 256, %s2021_s6, %s814_s9, %s1657_s28, %s1657_s28, %s1658_s7  }
 0x546 PF: > { %s842_s5 = sand.u32 1, %s1634_s12   ;;  %p2090_p6 = scmp.ne.s32.totalorder %s2078_s24, 0 }
 0x547   : > { %p2091_p12 = scmp.ge.s32.totalorder %s1646_s15, 2  ;;  %s843_s30 = scalar_lea.sflag [#allocation4], %s842_s5 }
 0x549   : > { %p1436_p0 = pnand %p2091_p12, %p2090_p6 }
 0x54b   : > { %1629 = dma.done.wait (!%p1436_p0), %s843_s30, 256  }
 0x54c   : > { %1631 = vsyncadd (!%p1436_p0), %s843_s30, 4294967040  ;;  %p19_p8 = scmp.ge.s32.totalorder %s1704_s18, 4   ;;  %s2092_s12 = smov %s1638_s13 }
 0x54d   : > { %s2093_s13 = smov %s1642_s14  ;;  %s2094_s14 = smov %s1716_s21 }
 0x54e   : > { %s2095_s15 = smov %s1704_s18  ;;  %21 = sbr.rel (!%p19_p8) target bundleno = 7 (0x7), region = 106 }
 0x555   :  { %848 = vsyncpa [#allocation3], 1 }
 0x556   :  { %850 = vsyncpa [#allocation3 + $0x1], 1 }
 0x557   :  { %851 = vsyncpa [#allocation6], 1 }
 0x558   :  { %853 = vsyncpa [#allocation6 + $0x1], 1 }
 0x559   :  { %854 = vsyncpa [#allocation4], 1 }
 0x55a   :  { %856 = vsyncpa [#allocation4 + $0x1], 1 }

</bundles_post_ra>
